<compile_context>
chip_gen: v7x
topology: tpu7x:2x2x1
jax: 0.10.0
libtpu: 0.0.40
codegen_flags: <defaults>
</compile_context>

<pallas_src>
import jax
import jax.numpy as jnp
from jax.experimental import pallas as pl
from jax.experimental.pallas import tpu as pltpu


def _logreg_kernel(x_ref, w_ref, b_ref, o_ref):
    # x_ref: (tb, D) VMEM batch tile, w_ref: (1, D) VMEM (resident weight row),
    # b_ref: (1,) SMEM scalar bias, o_ref: (tb, 1) output tile.
    x = x_ref[...]
    w = w_ref[...]
    # VPU elementwise multiply + XLU lane reduction, f32 accumulation.
    z = jnp.sum(x * w, axis=-1, keepdims=True) + b_ref[0]
    # Exact sigmoid in f32 (exp runs on the EUP slot).
    o_ref[...] = (1.0 / (1.0 + jnp.exp(-z))).astype(o_ref.dtype)


def _round_up(n, m):
    return (n + m - 1) // m * m


def logistic_regression(x, w, b, *, vmem_budget_bytes=16 * 1024 * 1024):
    """x: (B, C, H, W) f32, w: (1, D) f32 (torch Linear weight), b: (1,) f32."""
    batch = x.shape[0]
    x2 = x.reshape(batch, -1)                    # row-major flatten == torch .view
    d = x2.shape[1]

    # Lane-align the feature dim; sublane-align / tile the batch dim.
    d_pad = _round_up(d, 128)
    bytes_per_row = d_pad * jnp.dtype(x2.dtype).itemsize
    # Double-buffered x tile must fit the VMEM budget (keeps v7x's 64 MiB happy).
    tb_cap = max(8, (vmem_budget_bytes // (2 * bytes_per_row)) // 8 * 8)
    tb_cap = min(tb_cap, 1024)

    if batch <= tb_cap:
        tb = _round_up(batch, 8)
        b_pad = tb
    else:
        tb = tb_cap
        b_pad = _round_up(batch, tb)

    if (b_pad, d_pad) != (batch, d):
        x2 = jnp.pad(x2, ((0, b_pad - batch), (0, d_pad - d)))
    w_row = w.reshape(1, d)
    if d_pad != d:
        w_row = jnp.pad(w_row, ((0, 0), (0, d_pad - d)))
    b_vec = b.reshape(1)

    out = pl.pallas_call(
        _logreg_kernel,
        out_shape=jax.ShapeDtypeStruct((b_pad, 1), x.dtype),
        grid_spec=pltpu.PrefetchScalarGridSpec(
            num_scalar_prefetch=0,
            grid=(b_pad // tb,),                              # batch tiles only
            in_specs=[
                pl.BlockSpec((tb, d_pad), lambda i: (i, 0)),  # x batch tile
                pl.BlockSpec((1, d_pad), lambda i: (0, 0)),   # weight row, resident
                pl.BlockSpec(memory_space=pltpu.MemorySpace.SMEM),  # bias scalar
            ],
            out_specs=pl.BlockSpec((tb, 1), lambda i: (i, 0)),
        ),
        compiler_params=pltpu.CompilerParams(
            dimension_semantics=("parallel",),                # independent batch tiles
        ),
    )(x2, w_row, b_vec)

    return out[:batch]


if __name__ == "__main__":
    # Small shapes consistent with the module: input_size = C*H*W = 3*16*16 = 768.
    B, C, H, W = 2, 3, 16, 16
    D = C * H * W

    key = jax.random.PRNGKey(0)
    kx, kw, kb = jax.random.split(key, 3)

    x = jax.random.normal(kx, (B, C, H, W), dtype=jnp.float32)
    # Deterministic "Linear" params (torch-style uniform(-1/sqrt(D), 1/sqrt(D))).
    bound = 1.0 / jnp.sqrt(jnp.float32(D))
    w = jax.random.uniform(kw, (1, D), dtype=jnp.float32, minval=-bound, maxval=bound)
    b = jax.random.uniform(kb, (1,), dtype=jnp.float32, minval=-bound, maxval=bound)

    out = jax.block_until_ready(logistic_regression(x, w, b))

    # Reference check in plain JAX.
    ref = jax.nn.sigmoid(x.reshape(B, -1) @ w.T + b)
    assert out.shape == (B, 1)
    assert jnp.allclose(out, ref, atol=1e-5, rtol=1e-5)

    print("KERNEL_OK")
</pallas_src>

<mosaic_0001>
module attributes {stable_mosaic.version = 11 : i64} {
  func.func @_logreg_kernel(%arg0: i32, %arg1: memref<8x768xf32, #tpu.memory_space<vmem>>, %arg2: memref<1x768xf32, #tpu.memory_space<vmem>>, %arg3: memref<1xf32, #tpu.memory_space<smem>>, %arg4: memref<8x1xf32, #tpu.memory_space<vmem>>) attributes {dimension_semantics = [#tpu.dimension_semantics<parallel>], iteration_bounds = array<i64: 1>, scalar_prefetch = 0 : i64, scratch_operands = 0 : i64, tpu.core_type = #tpu.core_type<tc>, window_params = [{transform_indices = @transform_0, window_bounds = array<i64: 8, 768>}, {pipeline_mode = #tpu.pipeline_mode<synchronous>, transform_indices = @transform_1, window_bounds = array<i64: 1, 768>}, {transform_indices = @transform_2, window_bounds = array<i64: 1>}, {transform_indices = @transform_3, window_bounds = array<i64: 8, 1>}]} {
    %c0 = arith.constant 0 : index
    %c0_0 = arith.constant 0 : index
    %0 = vector.load %arg1[%c0, %c0_0] : memref<8x768xf32, #tpu.memory_space<vmem>>, vector<8x768xf32>
    %c0_1 = arith.constant 0 : index
    %c0_2 = arith.constant 0 : index
    %1 = vector.load %arg2[%c0_1, %c0_2] : memref<1x768xf32, #tpu.memory_space<vmem>>, vector<1x768xf32>
    %2 = vector.broadcast %1 : vector<1x768xf32> to vector<8x768xf32>
    %3 = arith.mulf %0, %2 : vector<8x768xf32>
    %cst = arith.constant dense<0.000000e+00> : vector<8xf32>
    %4 = vector.multi_reduction <add>, %3, %cst [1] : vector<8x768xf32> to vector<8xf32>
    %5 = vector.shape_cast %4 : vector<8xf32> to vector<8x1xf32>
    %c0_3 = arith.constant 0 : index
    %6 = memref.load %arg3[%c0_3] : memref<1xf32, #tpu.memory_space<smem>>
    %7 = vector.broadcast %6 : f32 to vector<8x1xf32>
    %8 = arith.addf %5, %7 : vector<8x1xf32>
    %cst_4 = arith.constant 0.000000e+00 : f32
    %9 = vector.broadcast %cst_4 : f32 to vector<8x1xf32>
    %10 = arith.subf %9, %8 : vector<8x1xf32>
    %11 = math.exp %10 : vector<8x1xf32>
    %cst_5 = arith.constant 1.000000e+00 : f32
    %12 = vector.broadcast %cst_5 : f32 to vector<8x1xf32>
    %13 = arith.addf %12, %11 : vector<8x1xf32>
    %cst_6 = arith.constant 1.000000e+00 : f32
    %14 = vector.broadcast %cst_6 : f32 to vector<8x1xf32>
    %15 = arith.divf %14, %13 : vector<8x1xf32>
    %c0_7 = arith.constant 0 : index
    %c0_8 = arith.constant 0 : index
    %16 = vector.load %arg4[%c0_7, %c0_8] : memref<8x1xf32, #tpu.memory_space<vmem>>, vector<8x1xf32>
    tpu.vector_store %arg4[%c0_7, %c0_8], %15 {strides = array<i32>} : memref<8x1xf32, #tpu.memory_space<vmem>>, vector<8x1xf32>,
    return
  }
  func.func @transform_0(%arg0: i32) -> (i32, i32) {
    %c0_i32 = arith.constant 0 : i32
    %c0_i32_0 = arith.constant 0 : i32
    return %arg0, %c0_i32 : i32, i32
  }
  func.func @transform_1(%arg0: i32) -> (i32, i32) {
    %c0_i32 = arith.constant 0 : i32
    %c0_i32_0 = arith.constant 0 : i32
    %c0_i32_1 = arith.constant 0 : i32
    return %c0_i32, %c0_i32_0 : i32, i32
  }
  func.func @transform_2(%arg0: i32) -> i32 {
    %c0_i32 = arith.constant 0 : i32
    %c0_i32_0 = arith.constant 0 : i32
    return %c0_i32 : i32
  }
  func.func @transform_3(%arg0: i32) -> (i32, i32) {
    %c0_i32 = arith.constant 0 : i32
    %c0_i32_0 = arith.constant 0 : i32
    return %arg0, %c0_i32 : i32, i32
  }
}

</mosaic_0001>

<bundles_post_ra>
// kernel: tpu_custom_call.1
= control target key start
LH: loop header
LB: loop body
LE: loop exit
PB: predicated region body
PF: predicated region fallthrough
CT: control target
= control target key end

     0   :  { %9 = vsyncpa [#allocation4], 0  ;;  %s123_s12 = smov [#allocation3]   ;;  %s165_s0 = inlined_call_operand.hbm [shape: f32[8,768], index: 0, kind: input, shape index: {}]   ;;  %s166_s1 = inlined_call_operand.vmem [shape: f32[1,768], index: 1, kind: input, shape index: {}]   ;;  %s167_s2 = inlined_call_operand.<no memory space> [shape: f32[1], index: 2, kind: input, shape index: {}]   ;;  %s168_s3 = inlined_call_operand.vmem [shape: f32[8,1], index: 3, kind: output, shape index: {}]  }
   0x1   :  { %s16_s13 = sshll.u32 %s123_s12, 4  ;;  %s99_s16 = scalar_lea.hbm %s165_s0, 768  ;;  %s17_s13 = int_to_ptr.vmem [resolvable:$true] %s16_s13 }
   0x2   :  { %p100_p0 = scmp.ne.s32.totalorder %s165_s0, %s99_s16  ;;  %p103_p1 = scmp.lt.u32.totalorder %s99_s16, %s165_s0 }
   0x4   :  { %p105_p2 = pnand %p103_p1, %p100_p0 }
   0x6   :  { %108 = shalt.err (!%p105_p2)
}
   0x7   :  { %s109_s21 = scalar_lea.vmem %s17_s13, 768  ;;  %p114_p4 = scmp.lt.s32.totalorder %s17_s13, %s17_s13 }
   0x8   :  { %p110_p3 = scmp.ne.s32.totalorder %s17_s13, %s109_s21  ;;  %p115_p5 = scmp.lt.s32.totalorder %s109_s21, %s109_s21 }
   0xa   :  { %p116_p6 = por %p115_p5, %p114_p4 }
   0xc   :  { %p117_p7 = pnand %p116_p6, %p110_p3 }
   0xe   :  { %120 = shalt.err (!%p117_p7)
}
   0xf   :  { %19 = dma.hbm_to_vmem [thread:$0]  %s165_s0, 768, %s17_s13, [#allocation4]  }
  0x10   :  { %121 = dma.done.wait [#allocation4], 768  }
  0x11   :  { %122 = vsyncadd [#allocation4], 4294966528  ;;  %v35_v0 = vlaneseq  ;;  %v27_v6 = vld [vmem:[#allocation3] sm:$0xff]  ;;  %v28_v8 = vld [vmem:[#allocation3 + $0x8] sm:$0xff]  ;;  %v79_v32 = vstv %s167_s2  ;;  %vm87_vm0 = vcmask 7168  }
  0x12   :  { %v29_v9 = vld [vmem:[#allocation3 + $0x10] sm:$0xff]  ;;  %v33_v10 = vld [vmem:[%s166_s1] sm:$0x3f]  ;;  %v30_v16 = vld [vmem:[#allocation3 + $0x18] sm:$0xff] }
  0x13   :  { %v36_v1 = vshrl.u32 %v35_v0, 7  ;;  %v31_v21 = vld [vmem:[#allocation3 + $0x20] sm:$0xff]  ;;  %v32_v25 = vld [vmem:[#allocation3 + $0x28] sm:$0xff] }
  0x15   :  { %v37_v2 = vsub.s32 0, %v36_v1  ;;  %v41_v3 = vsub.s32 1, %v36_v1  ;;  %v45_v4 = vsub.s32 2, %v36_v1  ;;  %v49_v5 = vsub.s32 3, %v36_v1 }
  0x16   :  { %v53_v7 = vsub.s32 4, %v36_v1  ;;  %v57_v11 = vsub.s32 5, %v36_v1 }
  0x17   :  { %v38_v12 = vrot.slane %v33_v10, %v37_v2  ;;  %v42_v13 = vrot.slane %v33_v10, %v41_v3  ;;  %v46_v14 = vrot.slane %v33_v10, %v45_v4  ;;  %v50_v15 = vrot.slane %v33_v10, %v49_v5 }
  0x18   :  { %v54_v17 = vrot.slane %v33_v10, %v53_v7  ;;  %v58_v22 = vrot.slane %v33_v10, %v57_v11 }
  0x19   :  { %v65_v18 = vmul.f32 %v38_v12, %v27_v6  ;;  %v66_v19 = vmul.f32 %v42_v13, %v28_v8  ;;  %v67_v20 = vmul.f32 %v46_v14, %v29_v9  ;;  %v68_v23 = vmul.f32 %v50_v15, %v30_v16 }
  0x1a   :  { %v69_v26 = vmul.f32 %v54_v17, %v31_v21  ;;  %v70_v28 = vmul.f32 %v58_v22, %v32_v25 }
  0x1b   :  { %v71_v24 = vadd.f32 %v66_v19, %v65_v18 }
  0x1d   :  { %v72_v27 = vadd.f32 %v71_v24, %v67_v20 }
  0x1f   :  { %v73_v29 = vadd.f32 %v72_v27, %v68_v23 }
  0x21   :  { %v74_v30 = vadd.f32 %v73_v29, %v69_v26 }
  0x23   :  { %v75_v31 = vadd.f32 %v74_v30, %v70_v28 }
  0x25   :  { %76 = vadd.xlane.f32.xlu0 %v75_v31 }
  0xb2   :  { %v77_v33 = vpop.xlane.xlu0 %76 }
  0xb3   :  { %v80_v34 = vadd.f32 %v79_v32, %v77_v33 }
  0xb5   :  { %v81_v35 = vsub.f32 0.0, %v80_v34 }
  0xb7   :  { %v82_v36 = vmul.f32 1.442695, %v81_v35 }
  0xb9   :  { %95 = vpow2.f32 %v82_v36 }
  0xc3   :  { %v96_v37 = vpop.eup %95 }
  0xc4   :  { %v84_v38 = vadd.f32 1.0, %v96_v37 }
  0xc6   :  { %97 = vrcp.f32 %v84_v38 }
  0xd0   :  { %v98_v39 = vpop.eup %97 }
  0xd1   :  { %88 = vst.msk [vmem:[%s168_s3] sm:$0xff] %vm87_vm0, %v98_v39 }
  0xd2   :  { %93 = vsyncpa [#allocation4], 1 }

</bundles_post_ra>
